<compile_context>
chip_gen: v7x
topology: tpu7x:2x2x1
jax: 0.10.0
libtpu: 0.0.40
codegen_flags: <defaults>
</compile_context>

<pallas_src>
import functools

import numpy as np

import jax
import jax.numpy as jnp
from jax.experimental import pallas as pl
from jax.experimental.pallas import tpu as pltpu


def _round_up(x, m):
    return ((x + m - 1) // m) * m


def _pelvis_align_matrix(num_kp, pelvis_id):
    """C x C matrix M with (d @ M)[:, j] = d[:, j] - d[:, 3*pelvis_id + j%3]."""
    C = 3 * num_kp
    M = np.eye(C, dtype=np.float32)
    cols = np.arange(C)
    M[3 * pelvis_id + (cols % 3), cols] -= 1.0
    return jnp.asarray(M)


def _kp3d_loss_kernel(*refs, loss_type, pelvis_align):
    if pelvis_align:
        pred_ref, gt_ref, align_ref, ones_ref, out_ref = refs
    else:
        pred_ref, gt_ref, ones_ref, out_ref = refs

    # Upcast inside the kernel: inputs are DMA'd in their native dtype (bf16
    # inputs halve HBM traffic); no wrapper-side f32 copy in HBM.
    p = pred_ref[...].astype(jnp.float32)
    g = gt_ref[...].astype(jnp.float32)
    d = p - g                                             # VPU elementwise

    if pelvis_align:
        # Pelvis centering as one constant matmul on the idle MXU (replaces
        # 3 single-lane XLU broadcasts + a VPU select tree).
        d = jnp.dot(d, align_ref[...],
                    preferred_element_type=jnp.float32,
                    precision=jax.lax.Precision.HIGHEST)

    if loss_type == "l1":
        e = jnp.abs(d)                                    # VPU
    elif loss_type == "l2":
        e = d * d                                         # VPU
    else:
        raise NotImplementedError("Unsupported loss function")

    # Per-row reduce as a skinny ones-matmul on the MXU (vector-extended slot)
    # instead of a cross-lane XLU sum.  NOTE: rows are independent, so garbage
    # rows read in a padded/partial last block only affect their own (masked
    # on writeback) outputs -- do not add any cross-row reduction here.
    out_ref[...] = jnp.dot(e, ones_ref[...],
                           preferred_element_type=jnp.float32,
                           precision=jax.lax.Precision.HIGHEST)


def keypoint_3d_loss(pred_keypoints_3d, gt_keypoints_3d, pelvis_id=0,
                     pelvis_align=False, loss_type="l1", tile_r=None):
    """pred: [B, S, N, 3], gt: [B, S, N, 3]  ->  loss [B, S] (float32)."""
    B, S, N, D = pred_keypoints_3d.shape
    assert D == 3
    assert gt_keypoints_3d.shape == (B, S, N, 3)

    R = B * S
    C = N * D

    # Metadata-only reshape: no pad / cast / extra HBM pass.  The lane dim of
    # each block is the full array dim C, which satisfies the (8, 128) rule.
    pred2 = pred_keypoints_3d.reshape(R, C)
    gt2 = gt_keypoints_3d.reshape(R, C)

    # Dtype-safe row multiple: 8 for 4-byte, 16 for 2-byte, 32 for 1-byte
    # inputs (sub-32-bit dtypes pack along sublanes).
    itemsize = max(jnp.dtype(pred2.dtype).itemsize,
                   jnp.dtype(gt2.dtype).itemsize)
    row_mult = max(8, 32 // itemsize)

    if tile_r is None:
        # Aim for >=2 grid steps when R allows it, so v7x's two TensorCores
        # both get work via the "parallel" grid axis; cap at 4096 rows
        # (~12 MiB double-buffered f32 VMEM after the 72->128 lane padding) to
        # amortize the ~0.35 us per-step overhead.
        tile_r = max(row_mult,
                     min(4096,
                         _round_up(pl.cdiv(R, 2), row_mult),
                         _round_up(R, row_mult)))
    grid = (pl.cdiv(R, tile_r),)

    kernel = functools.partial(_kp3d_loss_kernel, loss_type=loss_type,
                               pelvis_align=pelvis_align)

    in_specs = [pl.BlockSpec((tile_r, C), lambda i: (i, 0)),
                pl.BlockSpec((tile_r, C), lambda i: (i, 0))]
    operands = [pred2, gt2]
    if pelvis_align:
        # Small constant matrices stay resident in VMEM (same block every
        # grid step -> no re-DMA).
        in_specs.append(pl.BlockSpec((C, C), lambda i: (0, 0)))
        operands.append(_pelvis_align_matrix(N, pelvis_id))
    in_specs.append(pl.BlockSpec((C, 1), lambda i: (0, 0)))
    operands.append(jnp.ones((C, 1), jnp.float32))

    in_bytes = R * C * (jnp.dtype(pred2.dtype).itemsize
                        + jnp.dtype(gt2.dtype).itemsize)
    flops = 4 * R * C + (2 * R * C * C if pelvis_align else 0)
    cost = pl.CostEstimate(flops=flops, transcendentals=0,
                           bytes_accessed=in_bytes + R * 4)

    out = pl.pallas_call(
        kernel,
        out_shape=jax.ShapeDtypeStruct((R, 1), jnp.float32),
        grid=grid,
        in_specs=in_specs,
        out_specs=pl.BlockSpec((tile_r, 1), lambda i: (i, 0)),
        compiler_params=pltpu.CompilerParams(
            dimension_semantics=("parallel",),
            vmem_limit_bytes=32 * 1024 * 1024),
        cost_estimate=cost,
    )(*operands)

    return out.reshape(B, S)


def _reference(pred, gt, pelvis_id, pelvis_align, loss_type):
    pred = pred.astype(jnp.float32)
    gt = gt.astype(jnp.float32)
    if pelvis_align:
        pred = pred - pred[:, :, pelvis_id:pelvis_id + 1, :]
        gt = gt - gt[:, :, pelvis_id:pelvis_id + 1, :]
    d = pred - gt
    e = jnp.abs(d) if loss_type == "l1" else d * d
    return e.sum(axis=(2, 3))


if __name__ == "__main__":
    # Shapes consistent with the forward: B=2 batch, S=8 samples, N=24
    # keypoints, 3 coords.
    B, S, N = 2, 8, 24
    key = jax.random.PRNGKey(0)
    k1, k2 = jax.random.split(key)
    pred = jax.random.normal(k1, (B, S, N, 3), dtype=jnp.float32)
    gt = jax.random.normal(k2, (B, S, N, 3), dtype=jnp.float32)

    cases = [("l1", True, 0), ("l1", False, 0), ("l2", True, 2), ("l2", False, 0)]
    for loss_type, align, pid in cases:
        got = jax.block_until_ready(
            keypoint_3d_loss(pred, gt, pelvis_id=pid, pelvis_align=align,
                             loss_type=loss_type))
        ref = _reference(pred, gt, pid, align, loss_type)
        assert got.shape == (B, S)
        assert jnp.allclose(got, ref, rtol=1e-4, atol=1e-4), (loss_type, align, pid)

    # bf16 inputs (halves HBM bytes; the main lever on v5e) -- drop-in, the
    # kernel upcasts to f32 in VMEM and the row tile rounds to 16.
    pred_h = pred.astype(jnp.bfloat16)
    gt_h = gt.astype(jnp.bfloat16)
    got_h = jax.block_until_ready(
        keypoint_3d_loss(pred_h, gt_h, pelvis_id=1, pelvis_align=True,
                         loss_type="l2"))
    ref_h = _reference(pred_h, gt_h, 1, True, "l2")
    assert jnp.allclose(got_h, ref_h, rtol=1e-4, atol=1e-4)

    # Exercise a multi-step grid and a partial (masked) last row block.
    B2, S2 = 2, 7
    k3, k4 = jax.random.split(k2)
    pred_b = jax.random.normal(k3, (B2, S2, N, 3), dtype=jnp.float32)
    gt_b = jax.random.normal(k4, (B2, S2, N, 3), dtype=jnp.float32)
    got_b = jax.block_until_ready(
        keypoint_3d_loss(pred_b, gt_b, pelvis_id=0, pelvis_align=True,
                         loss_type="l1", tile_r=8))
    ref_b = _reference(pred_b, gt_b, 0, True, "l1")
    assert jnp.allclose(got_b, ref_b, rtol=1e-4, atol=1e-4)

    print("KERNEL_OK")
</pallas_src>

<mosaic_0001>
module attributes {stable_mosaic.version = 11 : i64} {
  func.func @_kp3d_loss_kernel(%arg0: i32, %arg1: memref<8x72xf32, #tpu.memory_space<vmem>>, %arg2: memref<8x72xf32, #tpu.memory_space<vmem>>, %arg3: memref<72x72xf32, #tpu.memory_space<vmem>>, %arg4: memref<72x1xf32, #tpu.memory_space<vmem>>, %arg5: memref<8x1xf32, #tpu.memory_space<vmem>>) attributes {dimension_semantics = [#tpu.dimension_semantics<parallel>], iteration_bounds = array<i64: 2>, scalar_prefetch = 0 : i64, scratch_operands = 0 : i64, tpu.core_type = #tpu.core_type<tc>, window_params = [{transform_indices = @transform_0, window_bounds = array<i64: 8, 72>}, {transform_indices = @transform_1, window_bounds = array<i64: 8, 72>}, {pipeline_mode = #tpu.pipeline_mode<synchronous>, transform_indices = @transform_2, window_bounds = array<i64: 72, 72>}, {pipeline_mode = #tpu.pipeline_mode<synchronous>, transform_indices = @transform_3, window_bounds = array<i64: 72, 1>}, {transform_indices = @transform_4, window_bounds = array<i64: 8, 1>}]} {
    %c0 = arith.constant 0 : index
    %c0_0 = arith.constant 0 : index
    %0 = vector.load %arg1[%c0, %c0_0] : memref<8x72xf32, #tpu.memory_space<vmem>>, vector<8x72xf32>
    %c0_1 = arith.constant 0 : index
    %c0_2 = arith.constant 0 : index
    %1 = vector.load %arg2[%c0_1, %c0_2] : memref<8x72xf32, #tpu.memory_space<vmem>>, vector<8x72xf32>
    %2 = arith.subf %0, %1 : vector<8x72xf32>
    %c0_3 = arith.constant 0 : index
    %c0_4 = arith.constant 0 : index
    %3 = vector.load %arg3[%c0_3, %c0_4] : memref<72x72xf32, #tpu.memory_space<vmem>>, vector<72x72xf32>
    %cst = arith.constant dense<0.000000e+00> : vector<8x72xf32>
    %4 = tpu.matmul %2, %3, %cst {dimension_numbers = #tpu.dot_dimension_numbers<[1], [0], [0], [1], [0, 0, 1, 1], [], []>, precision = #tpu.contract_precision<fp32>} : vector<8x72xf32>, vector<72x72xf32>, vector<8x72xf32> -> vector<8x72xf32>
    %5 = math.absf %4 : vector<8x72xf32>
    %c0_5 = arith.constant 0 : index
    %c0_6 = arith.constant 0 : index
    %6 = vector.load %arg4[%c0_5, %c0_6] : memref<72x1xf32, #tpu.memory_space<vmem>>, vector<72x1xf32>
    %cst_7 = arith.constant dense<0.000000e+00> : vector<8x1xf32>
    %7 = tpu.matmul %5, %6, %cst_7 {dimension_numbers = #tpu.dot_dimension_numbers<[1], [0], [0], [1], [0, 0, 1, 1], [], []>, precision = #tpu.contract_precision<fp32>} : vector<8x72xf32>, vector<72x1xf32>, vector<8x1xf32> -> vector<8x1xf32>
    %c0_8 = arith.constant 0 : index
    %c0_9 = arith.constant 0 : index
    %8 = vector.load %arg5[%c0_8, %c0_9] : memref<8x1xf32, #tpu.memory_space<vmem>>, vector<8x1xf32>
    tpu.vector_store %arg5[%c0_8, %c0_9], %7 {strides = array<i32>} : memref<8x1xf32, #tpu.memory_space<vmem>>, vector<8x1xf32>,
    return
  }
  func.func @transform_0(%arg0: i32) -> (i32, i32) {
    %c0_i32 = arith.constant 0 : i32
    %c0_i32_0 = arith.constant 0 : i32
    return %arg0, %c0_i32 : i32, i32
  }
  func.func @transform_1(%arg0: i32) -> (i32, i32) {
    %c0_i32 = arith.constant 0 : i32
    %c0_i32_0 = arith.constant 0 : i32
    return %arg0, %c0_i32 : i32, i32
  }
  func.func @transform_2(%arg0: i32) -> (i32, i32) {
    %c0_i32 = arith.constant 0 : i32
    %c0_i32_0 = arith.constant 0 : i32
    %c0_i32_1 = arith.constant 0 : i32
    return %c0_i32, %c0_i32_0 : i32, i32
  }
  func.func @transform_3(%arg0: i32) -> (i32, i32) {
    %c0_i32 = arith.constant 0 : i32
    %c0_i32_0 = arith.constant 0 : i32
    %c0_i32_1 = arith.constant 0 : i32
    return %c0_i32, %c0_i32_0 : i32, i32
  }
  func.func @transform_4(%arg0: i32) -> (i32, i32) {
    %c0_i32 = arith.constant 0 : i32
    %c0_i32_0 = arith.constant 0 : i32
    return %arg0, %c0_i32 : i32, i32
  }
}

</mosaic_0001>

<bundles_post_ra>
// kernel: tpu_custom_call.1
= control target key start
LH: loop header
LB: loop body
LE: loop exit
PB: predicated region body
PF: predicated region fallthrough
CT: control target
= control target key end

     0   :  { %9 = vsyncpa [#allocation3], 0  ;;  %s2679_s0 = inlined_call_operand.hbm [shape: f32[16,72], index: 0, kind: input, shape index: {}]   ;;  %s2680_s1 = inlined_call_operand.hbm [shape: f32[16,72], index: 1, kind: input, shape index: {}]   ;;  %s2681_s2 = inlined_call_operand.vmem [shape: f32[72,72], index: 2, kind: input, shape index: {}]   ;;  %s2682_s3 = inlined_call_operand.vmem [shape: f32[72,1], index: 3, kind: input, shape index: {}]   ;;  %s2683_s4 = inlined_call_operand.vmem [shape: f32[16,1], index: 4, kind: output, shape index: {}]  }
   0x1   :  { %11 = vsyncpa [#allocation3 + $0x1], 0 }
   0x2   :  { %12 = vsyncpa [#allocation5], 0 }
   0x3   :  { %14 = vsyncpa [#allocation5 + $0x1], 0  ;;  %s2195_s15 = smov 0   ;;  %s2197_s16 = smov 0  }
   0x4   :  { %s2199_s17 = smov 0   ;;  %s2201_s18 = smov 0  }
   0x5 LB: > { %s2214_s19 = sadd.s32 4294967295, %s2163_s18   ;;  %s2217_s20 = sadd.s32 1, %s2163_s18   ;;  %s2163_s18 = sphi %s2201_s18, %s2695_s18   ;;  %s2159_s17 = sphi %s2199_s17, %s2694_s17   ;;  %s2155_s16 = sphi %s2197_s16, %s2693_s16   ;;  %s2151_s15 = sphi %s2195_s15, %s2692_s15  }
   0x6   : > { %s24_s21 = ssub.s32 %s2163_s18, %s2217_s20  ;;  %s27_s22 = sadd.s32 1, %s2159_s17 }
   0x7   : > { %p25_p0 = scmp.eq.s32.totalorder %s24_s21, 0  ;;  %p34_p1 = scmp.ne.s32.totalorder %s2159_s17, %s2155_s16 }
   0x8   : > { %p35_p2 = scmp.eq.s32.totalorder %s2163_s18, 0  ;;  %p40_p3 = scmp.ne.s32.totalorder %s2155_s16, %s2151_s15 }
   0x9   : > { %s2227_s23 = scalar_select %p25_p0, %s2159_s17, %s27_s22  }
   0xa   : > { %p36_p4 = por %p35_p2, %p34_p1  ;;  %p41_p5 = scmp.eq.s32.totalorder %s2214_s19, 0 }
   0xb   : > { %p2029_p6 = scmp.lt.s32.totalorder %s2163_s18, 2  ;;  %s2236_s25 = sand.u32 1, %s2159_s17  }
   0xc   : > { %p2231_p7 = por %p41_p5, %p40_p3  ;;  %s1472_s26 = sshll.u32 %s2236_s25, 3 }
   0xd   : > { %s1473_s27 = sshll.u32 %s2163_s18, 7  ;;  %s168_s5 = scalar_lea.vmem [#allocation2], %s1472_s26 }
   0xe   : > { %s2685_s24 = scalar_select %p2231_p7, 1, 0 }
   0xf   : > { %s2245_s30 = scalar_lea.hbm %s2679_s0, %s1473_s27  ;;  %s175_s6 = sshll.u32 %s168_s5, 4  ;;  %s2249_s6 = int_to_ptr.vmem [resolvable:$true] %s175_s6 }
  0x10   : > { %p2251_p8 = pnand %p2029_p6, %p36_p4  ;;  %s165_s8 = scalar_lea.sflag [#allocation3], %s2236_s25 }
  0x11   : > { %s2065_s9 = scalar_lea.hbm %s2245_s30, 128  ;;  %s2070_s12 = scalar_lea.hbm %s2679_s0, 256 }
  0x12   : > { %p2066_p11 = scmp.ne.s32.totalorder %s2245_s30, %s2065_s9  ;;  %p2067_p12 = pneg %p2251_p8 }
  0x13   : > { %p2071_p1 = scmp.lt.u32.totalorder %s2245_s30, %s2679_s0  ;;  %p2072_p2 = scmp.lt.u32.totalorder %s2070_s12, %s2065_s9 }
  0x14   : > { %p2068_p13 = pnand %p2067_p12, %p2066_p11  ;;  %p2074_p4 = scmp.lt.u32.totalorder %s2065_s9, %s2245_s30 }
  0x15   : > { %p2073_p3 = por %p2072_p2, %p2071_p1 }
  0x16   : > { %p2069_p0 = pneg %p2068_p13 }
  0x17   : > { %p2075_p5 = por %p2074_p4, %p2073_p3 }
  0x19   : > { %p2076_p6 = pnand %p2075_p5, %p2069_p0 }
  0x1b   : > { %2079 = shalt.err (!%p2076_p6)
}
  0x1c   : > { %s2080_s15 = scalar_lea.vmem %s2249_s6, 128  ;;  %s2165_s21 = smov [#allocation2]  }
  0x1d   : > { %p2081_p11 = scmp.ne.s32.totalorder %s2249_s6, %s2080_s15  ;;  %s2085_s22 = sshll.u32 %s2165_s21, 4  ;;  %s2086_s22 = int_to_ptr.vmem [resolvable:$false] %s2085_s22 }
  0x1e   : > { %s2087_s28 = scalar_lea.vmem %s2086_s22, 256  ;;  %p2088_p10 = scmp.lt.s32.totalorder %s2249_s6, %s2086_s22 }
  0x1f   : > { %p2083_p13 = pnand %p2081_p11, %p2067_p12  ;;  %p2089_p1 = scmp.lt.s32.totalorder %s2087_s28, %s2080_s15 }
  0x21   : > { %p2084_p9 = pneg %p2083_p13  ;;  %p2090_p2 = por %p2089_p1, %p2088_p10 }
  0x23   : > { %p2091_p3 = pnand %p2090_p2, %p2084_p9 }
  0x25   : > { %2094 = shalt.err (!%p2091_p3)
}
  0x26   : > { %2025 = dma.hbm_to_vmem [thread:$0]  (!%p2251_p8), %s2245_s30, 128, %s2249_s6, %s165_s8  }
  0x27   : > { %p2687_p0 = scmp.lt.s32.totalorder %s2163_s18, 3  ;;  %p2688_p4 = scmp.ge.s32.totalorder %s2163_s18, 1 }
  0x28   : > { %s2296_s10 = scalar_lea.hbm %s2680_s1, %s1473_s27  ;;  %s186_s11 = scalar_lea.vmem [#allocation4], %s1472_s26 }
  0x29   : > { %p2287_p5 = pnand %p2688_p4, %p2687_p0  ;;  %s193_s12 = sshll.u32 %s186_s11, 4  ;;  %s194_s12 = int_to_ptr.vmem [resolvable:$true] %s193_s12 }
  0x2a   : > { %s183_s30 = scalar_lea.sflag [#allocation5], %s2236_s25  ;;  %s2095_s6 = scalar_lea.hbm %s2296_s10, 128 }
  0x2b   : > { %s2689_s29 = scalar_select %p2287_p5, 1, 0 }
  0x2c   : > { %p2096_p9 = scmp.ne.s32.totalorder %s2296_s10, %s2095_s6  ;;  %s2100_s27 = scalar_lea.hbm %s2680_s1, 256 }
  0x2d   : > { %p2101_p11 = scmp.lt.u32.totalorder %s2296_s10, %s2680_s1  ;;  %p2102_p13 = scmp.lt.u32.totalorder %s2100_s27, %s2095_s6 }
  0x2e   : > { %p2098_p10 = pnand %p2096_p9, %p2067_p12  ;;  %p2104_p2 = scmp.lt.u32.totalorder %s2095_s6, %s2296_s10 }
  0x2f   : > { %p2103_p1 = por %p2102_p13, %p2101_p11 }
  0x30   : > { %p2099_p6 = pneg %p2098_p10 }
  0x31   : > { %p2105_p3 = por %p2104_p2, %p2103_p1 }
  0x33   : > { %p2106_p0 = pnand %p2105_p3, %p2099_p6 }
  0x35   : > { %2109 = shalt.err (!%p2106_p0)
}
  0x36   : > { %s2110_s25 = scalar_lea.vmem %s194_s12, 128  ;;  %s2166_s26 = smov [#allocation4]  }
  0x37   : > { %p2111_p4 = scmp.ne.s32.totalorder %s194_s12, %s2110_s25  ;;  %s2115_s15 = sshll.u32 %s2166_s26, 4  ;;  %s2116_s15 = int_to_ptr.vmem [resolvable:$false] %s2115_s15 }
  0x38   : > { %s2117_s21 = scalar_lea.vmem %s2116_s15, 256  ;;  %p2118_p7 = scmp.lt.s32.totalorder %s194_s12, %s2116_s15 }
  0x39   : > { %p2113_p9 = pnand %p2111_p4, %p2067_p12  ;;  %p2119_p5 = scmp.lt.s32.totalorder %s2117_s21, %s2110_s25 }
  0x3b   : > { %p2114_p10 = pneg %p2113_p9  ;;  %p2120_p11 = por %p2119_p5, %p2118_p7 }
  0x3d   : > { %p2121_p13 = pnand %p2120_p11, %p2114_p10 }
  0x3f   : > { %2124 = shalt.err (!%p2121_p13)
}
  0x40   : > { %2028 = dma.hbm_to_vmem [thread:$0]  (!%p2251_p8), %s2296_s10, 128, %s194_s12, %s183_s30  }
  0x41   : > { %p2690_p6 = scmp.ne.s32.totalorder %s2689_s29, 0 }
  0x42   : > { %s204_s22 = sand.u32 (!%p2690_p6), 1, %s2155_s16   ;;  %p2691_p12 = scmp.ne.s32.totalorder (!%p2690_p6), %s2685_s24, 0 }
  0x43   : > { %202 = sbr.rel (%p2690_p6) target bundleno = 717 (0x2cd), region = 36  ;;  %s1477_s28 = sshll.u32 (!%p2690_p6), %s204_s22, 3 }
  0x44   : > { %s205_s5 = scalar_lea.sflag (!%p2690_p6), [#allocation3], %s204_s22  ;;  %s208_s9 = scalar_lea.vmem (!%p2690_p6), [#allocation2], %s1477_s28 }
  0x4a   : > { %2142 = dma.done.wait (%p2691_p12), %s205_s5, 128  }
  0x4b   : > { %2144 = vsyncadd (%p2691_p12), %s205_s5, 4294967168  ;;  %s214_s11 = scalar_lea.sflag [#allocation5], %s204_s22  ;;  %s217_s6 = scalar_lea.vmem [#allocation4], %s1477_s28 }
  0x4c   : > { %2146 = dma.done.wait (%p2691_p12), %s214_s11, 128  }
  0x4d   : > { %2148 = vsyncadd (%p2691_p12), %s214_s11, 4294967168  ;;  %v2167_v0 = vmov 0.0|0.0   ;;  %vm2168_vm0 = vmmov 0   ;;  %v2169_v1 = vmov 0.0   ;;  %v253_v2 = vld [vmem:[%s2681_s2] sm:$0xff]  ;;  %v254_v3 = vld [vmem:[%s2681_s2 + $0x8] sm:$0xff] }
  0x4e   : > { %1854 = vmatprep.subr.bf16.mxu0 %v2167_v0  ;;  %1620 = vmatprep.mubr.msk.f32.mxu0 %vm2168_vm0, %v2169_v1  ;;  %v255_v4 = vld [vmem:[%s2681_s2 + $0x10] sm:$0xff]  ;;  %v267_v5 = vand.u32 4294901760, %v253_v2  ;;  %v270_v6 = vand.u32 4294901760, %v254_v3  ;;  %v256_v7 = vld [vmem:[%s2681_s2 + $0x18] sm:$0xff]  ;;  %v257_v9 = vld [vmem:[%s2681_s2 + $0x20] sm:$0xff]  ;;  %vm262_vm1 = vcmask 588800  }
  0x4f   : > { %1926 = vmatprep.subr.bf16.mxu1 %v2167_v0  ;;  %1746 = vmatprep.mubr.msk.f32.mxu1 %vm2168_vm0, %v2169_v1  ;;  %v273_v8 = vand.u32 4294901760, %v255_v4  ;;  %v258_v10 = vld [vmem:[%s2681_s2 + $0x28] sm:$0xff]  ;;  %v276_v11 = vand.u32 4294901760, %v256_v7  ;;  %v251_v16 = vld [vmem:[%s217_s6] sm:$0xff]  ;;  %v279_v17 = vand.u32 4294901760, %v257_v9  ;;  %v261_v44 = vld [vmem:[%s2681_s2 + $0x40] sm:$0xff] }
  0x50   : > { %v2355_v12 = vpack.c.bf16 %v270_v6, %v267_v5  ;;  %v2357_v13 = vsub.f32 %v253_v2, %v267_v5  ;;  %v2359_v14 = vsub.f32 %v254_v3, %v270_v6  ;;  %v250_v15 = vld [vmem:[%s208_s9] sm:$0xff]  ;;  %v282_v18 = vand.u32 4294901760, %v258_v10  ;;  %v259_v21 = vld [vmem:[%s2681_s2 + $0x30] sm:$0xff]  ;;  %v260_v22 = vld [vmem:[%s2681_s2 + $0x38] sm:$0xff]  ;;  %p246_p7 = scmp.lt.s32.totalorder %s2214_s19, 1 }
  0x51   : > { %v2362_v19 = vpack.c.bf16 %v276_v11, %v273_v8  ;;  %v2364_v20 = vsub.f32 %v255_v4, %v273_v8  ;;  %v252_v23 = vsub.f32 %v250_v15, %v251_v16  ;;  %v2373_v24 = vsub.f32 %v256_v7, %v276_v11  ;;  %v817_v51 = vld [vmem:[%s2682_s3] sm:$0xff]  ;;  %v818_v52 = vld [vmem:[%s2682_s3 + $0x8] sm:$0xff] }
  0x52   : > { %1856 = vmatpush3.bf16.msra.mxu0 %v2355_v12  ;;  %v353_v25 = vand.u32 4294901760, %v2357_v13  ;;  %v360_v26 = vand.u32 4294901760, %v2359_v14  ;;  %v2377_v27 = vpack.c.bf16 %v282_v18, %v279_v17  ;;  %v285_v29 = vand.u32 4294901760, %v259_v21  ;;  %s2697_s19 = smov (!%p246_p7, %s2214_s19), 1 }
  0x53   : > { %1857 = vmatprep.subr.bf16.mxu0 %v2167_v0  ;;  %v264_v28 = vsel %vm262_vm1, %v252_v23, 0  ;;  %v288_v30 = vand.u32 4294901760, %v260_v22  ;;  %v367_v32 = vand.u32 4294901760, %v2364_v20  ;;  %v2385_v33 = vsub.f32 %v257_v9, %v279_v17  ;;  %s1479_s22 = sshll.u32 %s2697_s19, 3 }
  0x54   : > { %v2381_v31 = vand.u32 4294901760, %v264_v28  ;;  %v2387_v34 = vsub.f32 %v258_v10, %v282_v18  ;;  %v354_v36 = vsub.f32 %v2357_v13, %v353_v25  ;;  %v361_v37 = vsub.f32 %v2359_v14, %v360_v26  ;;  %s249_s9 = scalar_lea.vmem %s2683_s4, %s1479_s22 }
  0x55   : > { %v374_v38 = vand.u32 4294901760, %v2373_v24  ;;  %v2400_v39 = vpack.c.bf16 %v288_v30, %v285_v29  ;;  %v2402_v40 = vsub.f32 %v259_v21, %v285_v29  ;;  %v368_v42 = vsub.f32 %v2364_v20, %v367_v32 }
  0x56   : > { %1859 = vmatpush3.bf16.msra.mxu0 %v2362_v19  ;;  %v2390_v35 = vsub.f32 %v264_v28, %v2381_v31  ;;  %v2409_v43 = vsub.f32 %v260_v22, %v288_v30  ;;  %v381_v45 = vand.u32 4294901760, %v2385_v33  ;;  %v388_v46 = vand.u32 4294901760, %v2387_v34 }
  0x57   : > { %1860 = vmatprep.subr.bf16.mxu0 %v2167_v0  ;;  %v355_v48 = vand.u32 4294901760, %v354_v36  ;;  %v362_v49 = vand.u32 4294901760, %v361_v37  ;;  %v375_v50 = vsub.f32 %v2373_v24, %v374_v38  ;;  %v2429_v53 = vand.u32 4294901760, %v261_v44 }
  0x58   : > { %v342_v41 = vand.u32 4294901760, %v2390_v35  ;;  %v369_v54 = vand.u32 4294901760, %v368_v42  ;;  %v395_v55 = vand.u32 4294901760, %v2402_v40  ;;  %v382_v57 = vsub.f32 %v2385_v33, %v381_v45 }
  0x59   : > { %v830_v58 = vand.u32 4294901760, %v817_v51  ;;  %v833_v59 = vand.u32 4294901760, %v818_v52  ;;  %v1867_v60 = vpack.c.bf16 %v362_v49, %v355_v48  ;;  %v376_v61 = vand.u32 4294901760, %v375_v50 }
  0x5a   : > { %1862 = vmatpush3.bf16.msra.mxu0 %v2377_v27  ;;  %v343_v47 = vsub.f32 %v2390_v35, %v342_v41  ;;  %v389_v62 = vsub.f32 %v2387_v34, %v388_v46  ;;  %v402_v63 = vand.u32 4294901760, %v2409_v43  ;;  %v2448_v5 = vsub.f32 %v261_v44, %v2429_v53  ;;  %v825_v44 = vld [vmem:[%s2682_s3 + $0x40] sm:$0xff] }
  0x5b   : > { %1863 = vmatprep.subr.bf16.mxu0 %v2167_v0  ;;  %v2440_v2 = vpack.c.bf16 %v833_v59, %v830_v58  ;;  %v2442_v3 = vsub.f32 %v817_v51, %v830_v58  ;;  %v2444_v4 = vsub.f32 %v818_v52, %v833_v59  ;;  %v396_v6 = vsub.f32 %v2402_v40, %v395_v55 }
  0x5c   : > { %v344_v56 = vand.u32 4294901760, %v343_v47  ;;  %v1870_v7 = vpack.c.bf16 %v376_v61, %v369_v54  ;;  %v383_v8 = vand.u32 4294901760, %v382_v57  ;;  %v390_v9 = vand.u32 4294901760, %v389_v62 }
  0x5d   : > { %v403_v10 = vsub.f32 %v2409_v43, %v402_v63  ;;  %1928 = vmatpush3.bf16.msra.mxu1 %v2440_v2  ;;  %v397_v15 = vand.u32 4294901760, %v396_v6  ;;  %v409_v17 = vand.u32 4294901760, %v2448_v5  ;;  %v1879_v23 = vpack.c.bf16 %v2359_v14, %v2357_v13 }
  0x5e   : > { %1865 = vmatpush3.bf16.msra.mxu0 %v2400_v39  ;;  %1929 = vmatprep.subr.bf16.mxu1 %v2167_v0  ;;  %v1873_v11 = vpack.c.bf16 %v390_v9, %v383_v8  ;;  %v1882_v28 = vpack.c.bf16 %v2373_v24, %v2364_v20  ;;  %v1885_v29 = vpack.c.bf16 %v2387_v34, %v2385_v33  ;;  %v823_v34 = vld [vmem:[%s2682_s3 + $0x30] sm:$0xff]  ;;  %v916_v48 = vand.u32 4294901760, %v2442_v3 }
  0x5f   : > { %1618 = vmatprep.subr.mxu0 %v2169_v1  ;;  %v404_v16 = vand.u32 4294901760, %v403_v10  ;;  %v410_v21 = vsub.f32 %v2448_v5, %v409_v17  ;;  %v1888_v30 = vpack.c.bf16 %v2409_v43, %v2402_v40  ;;  %v1903_v36 = vpack.c.bf16 %v360_v26, %v353_v25  ;;  %v821_v26 = vld [vmem:[%s2682_s3 + $0x20] sm:$0xff] }
  0x60   : > { %v1906_v37 = vpack.c.bf16 %v374_v38, %v367_v32  ;;  %v1909_v13 = vpack.c.bf16 %v388_v46, %v381_v45  ;;  %v1912_v14 = vpack.c.bf16 %v402_v63, %v395_v55  ;;  %v848_v38 = vand.u32 4294901760, %v823_v34 }
  0x61   : > { %v1876_v18 = vpack.c.bf16 %v404_v16, %v397_v15  ;;  %v411_v22 = vand.u32 4294901760, %v410_v21  ;;  %v923_v49 = vand.u32 4294901760, %v2444_v4  ;;  %v2582_v50 = vand.u32 4294901760, %v825_v44 }
  0x62   : > { %1619 = vmatpush3.msra.mxu0 %v2429_v53  ;;  %v2575_v46 = vsub.f32 %v823_v34, %v848_v38  ;;  %v917_v51 = vsub.f32 %v2442_v3, %v916_v48  ;;  %vm1379_vm2 = vcmask 7168  }
  0x63   : > { %1866 = vmatprep.subr.bf16.mxu0 %v2167_v0  ;;  %1621 = vmatmul.mubr.f32.vlgmr.msra.gmra.mrb[0].mxu0 %v344_v56  ;;  %v924_v52 = vsub.f32 %v2444_v4, %v923_v49 }
  0x64   : > { %1868 = vmatpush3.bf16.msra.mxu0 %v1867_v60  ;;  %1641 = vmatprep.mubr.msk.f32.mxu0 %vm2168_vm0, %v2169_v1  ;;  %v918_v55 = vand.u32 4294901760, %v917_v51  ;;  %v958_v10 = vand.u32 4294901760, %v2575_v46 }
  0x65   : > { %1869 = vmatprep.subr.bf16.mxu0 %v2167_v0  ;;  %v925_v56 = vand.u32 4294901760, %v924_v52 }
  0x66   : > { %v959_v16 = vsub.f32 %v2575_v46, %v958_v10 }
  0x67   : > { %v1939_v59 = vpack.c.bf16 %v925_v56, %v918_v55 }
  0x68   : > { %1871 = vmatpush3.bf16.msra.mxu0 %v1870_v7 }
  0x69   : > { %1872 = vmatprep.subr.bf16.mxu0 %v2167_v0 }
  0x6c   : > { %1874 = vmatpush3.bf16.msra.mxu0 %v1873_v11 }
  0x6d   : > { %1875 = vmatprep.subr.bf16.mxu0 %v2167_v0 }
  0x70   : > { %1877 = vmatpush3.bf16.msra.mxu0 %v1876_v18  ;;  %v960_v18 = vand.u32 4294901760, %v959_v16 }
  0x71   : > { %1639 = vmatprep.subr.mxu0 %v2169_v1 }
  0x74   : > { %1640 = vmatpush3.msra.mxu0 %v411_v22 }
  0x75   : > { %1878 = vmatprep.subr.bf16.mxu0 %v2167_v0  ;;  %1642 = vmatmul.mubr.f32.vlgmr.msra.gmra.mrb[0].mxu0 %v2381_v31 }
  0x76   : > { %1880 = vmatpush3.bf16.msra.mxu0 %v1879_v23  ;;  %1662 = vmatprep.mubr.msk.f32.mxu0 %vm2168_vm0, %v2169_v1  ;;  %v1951_v23 = vpack.c.bf16 %v2444_v4, %v2442_v3 }
  0x77   : > { %1881 = vmatprep.subr.bf16.mxu0 %v2167_v0 }
  0x7a   : > { %1883 = vmatpush3.bf16.msra.mxu0 %v1882_v28 }
  0x7b   : > { %1884 = vmatprep.subr.bf16.mxu0 %v2167_v0 }
  0x7e   : > { %1886 = vmatpush3.bf16.msra.mxu0 %v1885_v29 }
  0x7f   : > { %1887 = vmatprep.subr.bf16.mxu0 %v2167_v0 }
  0x82   : > { %1889 = vmatpush3.bf16.msra.mxu0 %v1888_v30 }
  0x83   : > { %1660 = vmatprep.subr.mxu0 %v2169_v1 }
  0x86   : > { %1661 = vmatpush3.msra.mxu0 %v2448_v5 }
  0x87   : > { %1890 = vmatprep.subr.bf16.mxu0 %v2167_v0  ;;  %1663 = vmatmul.mubr.f32.vlgmr.msra.gmra.mrb[0].mxu0 %v2390_v35  ;;  %v824_v35 = vld [vmem:[%s2682_s3 + $0x38] sm:$0xff] }
  0x88   : > { %1892 = vmatpush3.bf16.msra.mxu0 %v2355_v12  ;;  %1683 = vmatprep.mubr.msk.f32.mxu0 %vm2168_vm0, %v2169_v1 }
  0x89   : > { %1893 = vmatprep.subr.bf16.mxu0 %v2167_v0 }
  0x8c   : > { %1895 = vmatpush3.bf16.msra.mxu0 %v2362_v19 }
  0x8d   : > { %1896 = vmatprep.subr.bf16.mxu0 %v2167_v0 }
  0x90   : > { %1898 = vmatpush3.bf16.msra.mxu0 %v2377_v27 }
  0x91   : > { %1899 = vmatprep.subr.bf16.mxu0 %v2167_v0 }
  0x94   : > { %1901 = vmatpush3.bf16.msra.mxu0 %v2400_v39 }
  0x95   : > { %1681 = vmatprep.subr.mxu0 %v2169_v1 }
  0x98   : > { %1682 = vmatpush3.msra.mxu0 %v2429_v53 }
  0x99   : > { %1902 = vmatprep.subr.bf16.mxu0 %v2167_v0  ;;  %1684 = vmatmul.mubr.f32.vlgmr.msra.gmra.mrb[0].mxu0 %v342_v41 }
  0x9a   : > { %1904 = vmatpush3.bf16.msra.mxu0 %v1903_v36  ;;  %1704 = vmatprep.mubr.msk.f32.mxu0 %vm2168_vm0, %v2169_v1  ;;  %v1975_v36 = vpack.c.bf16 %v923_v49, %v916_v48 }
  0x9b   : > { %1905 = vmatprep.subr.bf16.mxu0 %v2167_v0 }
  0x9e   : > { %1907 = vmatpush3.bf16.msra.mxu0 %v1906_v37 }
  0x9f   : > { %1908 = vmatprep.subr.bf16.mxu0 %v2167_v0 }
  0xa2   : > { %1910 = vmatpush3.bf16.msra.mxu0 %v1909_v13 }
  0xa3   : > { %1911 = vmatprep.subr.bf16.mxu0 %v2167_v0 }
  0xa6   : > { %1913 = vmatpush3.bf16.msra.mxu0 %v1912_v14 }
  0xa7   : > { %1702 = vmatprep.subr.mxu0 %v2169_v1 }
  0xaa   : > { %1703 = vmatpush3.msra.mxu0 %v409_v17 }
  0xab   : > { %1914 = vmatprep.subr.bf16.mxu0 %v2167_v0  ;;  %1705 = vmatmul.mubr.f32.vlgmr.msra.gmra.mrb[0].mxu0 %v2381_v31 }
  0xac   : > { %1916 = vmatpush3.bf16.msra.mxu0 %v2355_v12  ;;  %1725 = vmatprep.mubr.msk.f32.mxu0 %vm2168_vm0, %v2169_v1  ;;  %v819_v12 = vld [vmem:[%s2682_s3 + $0x10] sm:$0xff] }
  0xad   : > { %1917 = vmatprep.subr.bf16.mxu0 %v2167_v0  ;;  %v836_v20 = vand.u32 4294901760, %v819_v12 }
  0xaf   : > { %v2562_v40 = vsub.f32 %v819_v12, %v836_v20 }
  0xb0   : > { %1919 = vmatpush3.bf16.msra.mxu0 %v2362_v19  ;;  %v820_v19 = vld [vmem:[%s2682_s3 + $0x18] sm:$0xff] }
  0xb1   : > { %1920 = vmatprep.subr.bf16.mxu0 %v2167_v0  ;;  %v839_v24 = vand.u32 4294901760, %v820_v19 }
  0xb3   : > { %v2542_v25 = vpack.c.bf16 %v839_v24, %v836_v20  ;;  %v2564_v41 = vsub.f32 %v820_v19, %v839_v24 }
  0xb4   : > { %1922 = vmatpush3.bf16.msra.mxu0 %v2377_v27  ;;  %v822_v27 = vld [vmem:[%s2682_s3 + $0x28] sm:$0xff] }
  0xb5   : > { %1923 = vmatprep.subr.bf16.mxu0 %v2167_v0  ;;  %1931 = vmatpush3.bf16.msra.mxu1 %v2542_v25  ;;  %v845_v32 = vand.u32 4294901760, %v822_v27  ;;  %v937_v54 = vand.u32 4294901760, %v2564_v41  ;;  %v1954_v28 = vpack.c.bf16 %v2564_v41, %v2562_v40 }
  0xb6   : > { %1932 = vmatprep.subr.bf16.mxu1 %v2167_v0 }
  0xb7   : > { %v2568_v43 = vsub.f32 %v822_v27, %v845_v32  ;;  %v938_v58 = vsub.f32 %v2564_v41, %v937_v54 }
  0xb8   : > { %1925 = vmatpush3.bf16.msra.mxu0 %v2400_v39  ;;  %v851_v39 = vand.u32 4294901760, %v824_v35 }
  0xb9   : > { %1723 = vmatprep.subr.mxu0 %v2169_v1  ;;  %v939_v61 = vand.u32 4294901760, %v938_v58  ;;  %v951_v63 = vand.u32 4294901760, %v2568_v43 }
  0xba   : > { %v2573_v45 = vpack.c.bf16 %v851_v39, %v848_v38  ;;  %v2577_v47 = vsub.f32 %v824_v35, %v851_v39 }
  0xbb   : > { %v952_v7 = vsub.f32 %v2568_v43, %v951_v63 }
  0xbc   : > { %1724 = vmatpush3.msra.mxu0 %v2429_v53  ;;  %v930_v53 = vand.u32 4294901760, %v2562_v40  ;;  %v965_v11 = vand.u32 4294901760, %v2577_v47  ;;  %v1960_v30 = vpack.c.bf16 %v2577_v47, %v2575_v46 }
  0xbd   : > { %1726 = vmatmul.mubr.f32.vlgmr.msra.gmra.mrb[0].mxu0 %v2381_v31  ;;  %v842_v31 = vand.u32 4294901760, %v821_v26  ;;  %v953_v9 = vand.u32 4294901760, %v952_v7 }
  0xbe   : > { %v931_v57 = vsub.f32 %v2562_v40, %v930_v53  ;;  %v966_v17 = vsub.f32 %v2577_v47, %v965_v11  ;;  %v1978_v37 = vpack.c.bf16 %v937_v54, %v930_v53  ;;  %v1984_v14 = vpack.c.bf16 %v965_v11, %v958_v10 }
  0xbf   : > { %v2552_v33 = vpack.c.bf16 %v845_v32, %v842_v31  ;;  %v2566_v42 = vsub.f32 %v821_v26, %v842_v31  ;;  %v971_v32 = vsub.f32 %v825_v44, %v2582_v50 }
  0xc0   : > { %v932_v60 = vand.u32 4294901760, %v931_v57  ;;  %v967_v21 = vand.u32 4294901760, %v966_v17 }
  0xc1   : > { %1934 = vmatpush3.bf16.msra.mxu1 %v2552_v33  ;;  %v944_v62 = vand.u32 4294901760, %v2566_v42  ;;  %v1957_v29 = vpack.c.bf16 %v2568_v43, %v2566_v42  ;;  %v972_v34 = vand.u32 4294901760, %v971_v32 }
  0xc2   : > { %1935 = vmatprep.subr.bf16.mxu1 %v2167_v0  ;;  %v1942_v5 = vpack.c.bf16 %v939_v61, %v932_v60  ;;  %v1948_v22 = vpack.c.bf16 %v967_v21, %v960_v18 }
  0xc3   : > { %v945_v6 = vsub.f32 %v2566_v42, %v944_v62  ;;  %v1981_v13 = vpack.c.bf16 %v951_v63, %v944_v62  ;;  %v973_v35 = vsub.f32 %v971_v32, %v972_v34 }
  0xc5   : > { %1937 = vmatpush3.bf16.msra.mxu1 %v2573_v45  ;;  %v946_v8 = vand.u32 4294901760, %v945_v6  ;;  %v974_v38 = vand.u32 4294901760, %v973_v35 }
  0xc6   : > { %1744 = vmatprep.subr.mxu1 %v2169_v1 }
  0xc7   : > { %v1945_v15 = vpack.c.bf16 %v953_v9, %v946_v8 }
  0xc9   : > { %1745 = vmatpush3.msra.mxu1 %v2582_v50 }
  0xca   : > { %1938 = vmatprep.subr.bf16.mxu1 %v2167_v0 }
 0x190   : > { %v812_v12 = vpop.f32.mrb[0].mxu0 }
 0x191   : > { %v816_v19 = vand.u32 2147483647, %v812_v12  ;;  %v1727_v20 = vpop.f32.mrb[1].mxu0 }
 0x193   : > { %v827_v24 = vsel %vm262_vm1, %v816_v19, 0 }
 0x194   : > { %v2610_v26 = vand.u32 4294901760, %v827_v24 }
 0x196   : > { %v904_v3 = vsub.f32 %v827_v24, %v2610_v26 }
 0x198   : > { %v905_v4 = vand.u32 4294901760, %v904_v3 }
 0x19a   : > { %v906_v27 = vsub.f32 %v904_v3, %v905_v4 }
 0x19c   : > { %v907_v31 = vand.u32 4294901760, %v906_v27 }
 0x19e   : > { %1747 = vmatmul.mubr.f32.vlgmr.msra.gmra.mrb[0].mxu1 %v907_v31 }
 0x19f   : > { %1940 = vmatpush3.bf16.msra.mxu1 %v1939_v59  ;;  %1767 = vmatprep.mubr.msk.f32.mxu1 %vm2168_vm0, %v2169_v1 }
 0x1a0   : > { %1941 = vmatprep.subr.bf16.mxu1 %v2167_v0 }
 0x1a3   : > { %1943 = vmatpush3.bf16.msra.mxu1 %v1942_v5 }
 0x1a4   : > { %1944 = vmatprep.subr.bf16.mxu1 %v2167_v0 }
 0x1a7   : > { %1946 = vmatpush3.bf16.msra.mxu1 %v1945_v15 }
 0x1a8   : > { %1947 = vmatprep.subr.bf16.mxu1 %v2167_v0 }
 0x1ab   : > { %1949 = vmatpush3.bf16.msra.mxu1 %v1948_v22 }
 0x1ac   : > { %1765 = vmatprep.subr.mxu1 %v2169_v1 }
 0x1af   : > { %1766 = vmatpush3.msra.mxu1 %v974_v38 }
 0x1b0   : > { %1768 = vmatmul.mubr.f32.vlgmr.msra.gmra.mrb[0].mxu1 %v2610_v26  ;;  %1950 = vmatprep.subr.bf16.mxu1 %v2167_v0 }
 0x1b1   : > { %1952 = vmatpush3.bf16.msra.mxu1 %v1951_v23  ;;  %1788 = vmatprep.mubr.msk.f32.mxu1 %vm2168_vm0, %v2169_v1 }
 0x1b2   : > { %1953 = vmatprep.subr.bf16.mxu1 %v2167_v0 }
 0x1b5   : > { %1955 = vmatpush3.bf16.msra.mxu1 %v1954_v28 }
 0x1b6   : > { %1956 = vmatprep.subr.bf16.mxu1 %v2167_v0 }
 0x1b9   : > { %1958 = vmatpush3.bf16.msra.mxu1 %v1957_v29 }
 0x1ba   : > { %1959 = vmatprep.subr.bf16.mxu1 %v2167_v0 }
 0x1bd   : > { %1961 = vmatpush3.bf16.msra.mxu1 %v1960_v30 }
 0x1be   : > { %1786 = vmatprep.subr.mxu1 %v2169_v1 }
 0x1c1   : > { %1787 = vmatpush3.msra.mxu1 %v971_v32 }
 0x1c2   : > { %1789 = vmatmul.mubr.f32.vlgmr.msra.gmra.mrb[0].mxu1 %v904_v3  ;;  %1962 = vmatprep.subr.bf16.mxu1 %v2167_v0 }
 0x1c3   : > { %1964 = vmatpush3.bf16.msra.mxu1 %v2440_v2  ;;  %1809 = vmatprep.mubr.msk.f32.mxu1 %vm2168_vm0, %v2169_v1 }
 0x1c4   : > { %1965 = vmatprep.subr.bf16.mxu1 %v2167_v0 }
 0x1c7   : > { %1967 = vmatpush3.bf16.msra.mxu1 %v2542_v25 }
 0x1c8   : > { %1968 = vmatprep.subr.bf16.mxu1 %v2167_v0 }
 0x1cb   : > { %1970 = vmatpush3.bf16.msra.mxu1 %v2552_v33 }
 0x1cc   : > { %1971 = vmatprep.subr.bf16.mxu1 %v2167_v0 }
 0x1cf   : > { %1973 = vmatpush3.bf16.msra.mxu1 %v2573_v45 }
 0x1d0   : > { %1807 = vmatprep.subr.mxu1 %v2169_v1 }
 0x1d3   : > { %1808 = vmatpush3.msra.mxu1 %v2582_v50 }
 0x1d4   : > { %1810 = vmatmul.mubr.f32.vlgmr.msra.gmra.mrb[0].mxu1 %v905_v4  ;;  %1974 = vmatprep.subr.bf16.mxu1 %v2167_v0 }
 0x1d5   : > { %1976 = vmatpush3.bf16.msra.mxu1 %v1975_v36  ;;  %1830 = vmatprep.mubr.msk.f32.mxu1 %vm2168_vm0, %v2169_v1 }
 0x1d6   : > { %1977 = vmatprep.subr.bf16.mxu1 %v2167_v0 }
 0x1d9   : > { %1979 = vmatpush3.bf16.msra.mxu1 %v1978_v37 }
 0x1da   : > { %1980 = vmatprep.subr.bf16.mxu1 %v2167_v0 }
 0x1dd   : > { %1982 = vmatpush3.bf16.msra.mxu1 %v1981_v13 }
 0x1de   : > { %1983 = vmatprep.subr.bf16.mxu1 %v2167_v0 }
 0x1e1   : > { %1985 = vmatpush3.bf16.msra.mxu1 %v1984_v14 }
 0x1e2   : > { %1828 = vmatprep.subr.mxu1 %v2169_v1 }
 0x1e5   : > { %1829 = vmatpush3.msra.mxu1 %v972_v34 }
 0x1e6   : > { %1831 = vmatmul.mubr.f32.vlgmr.msra.gmra.mrb[0].mxu1 %v2610_v26  ;;  %1986 = vmatprep.subr.bf16.mxu1 %v2167_v0 }
 0x1e7   : > { %1988 = vmatpush3.bf16.msra.mxu1 %v2440_v2  ;;  %1851 = vmatprep.mubr.msk.f32.mxu1 %vm2168_vm0, %v2169_v1 }
 0x1e8   : > { %1989 = vmatprep.subr.bf16.mxu1 %v2167_v0 }
 0x1eb   : > { %1991 = vmatpush3.bf16.msra.mxu1 %v2542_v25 }
 0x1ec   : > { %1992 = vmatprep.subr.bf16.mxu1 %v2167_v0 }
 0x1ef   : > { %1994 = vmatpush3.bf16.msra.mxu1 %v2552_v33 }
 0x1f0   : > { %1995 = vmatprep.subr.bf16.mxu1 %v2167_v0 }
 0x1f3   : > { %1997 = vmatpush3.bf16.msra.mxu1 %v2573_v45 }
 0x1f4   : > { %1849 = vmatprep.subr.mxu1 %v2169_v1 }
 0x1f7   : > { %1850 = vmatpush3.msra.mxu1 %v2582_v50 }
 0x1f8   : > { %1852 = vmatmul.mubr.f32.vlgmr.msra.gmra.mrb[0].mxu1 %v2610_v26 }
 0x2cb   : > { %v1375_v2 = vpop.f32.mrb[0].mxu1 }
 0x2cc   : > { %1380 = vst.msk [vmem:[%s249_s9] sm:$0xff] %vm1379_vm2, %v1375_v2  ;;  %v1853_v25 = vpop.f32.mrb[1].mxu1 }
 0x2cd PF: > { %p17_p8 = scmp.ge.s32.totalorder %s2217_s20, 4   ;;  %s2692_s15 = smov %s2155_s16 }
 0x2ce   : > { %s2693_s16 = smov %s2159_s17  ;;  %s2694_s17 = smov %s2227_s23 }
 0x2cf   : > { %s2695_s18 = smov %s2217_s20  ;;  %19 = sbr.rel (!%p17_p8) target bundleno = 5 (0x5), region = 89 }
 0x2d6   :  { %1400 = vsyncpa [#allocation3], 1 }
 0x2d7   :  { %1402 = vsyncpa [#allocation3 + $0x1], 1 }
 0x2d8   :  { %1403 = vsyncpa [#allocation5], 1 }
 0x2d9   :  { %1405 = vsyncpa [#allocation5 + $0x1], 1 }

</bundles_post_ra>
